<compile_context>
chip_gen: v7x
topology: tpu7x:2x2x1
jax: 0.10.0
libtpu: 0.0.40
codegen_flags: <defaults>
</compile_context>

<pallas_src>
import jax
import jax.numpy as jnp
from jax.experimental import pallas as pl
from jax.experimental.pallas import tpu as pltpu


_TILE_BYTES_PER_INPUT = 4 * 1024 * 1024  # 2 inputs x 2 pipeline buffers x 4 MiB = 16 MiB VMEM


def _joints_mse_kernel(pred_ref, gt_ref, rowsq_ref):
    """Per-row sum of squared differences for this tile of rows."""
    p = pred_ref[...].astype(jnp.float32)   # (TR, HW)
    g = gt_ref[...].astype(jnp.float32)     # (TR, HW)
    d = p - g
    rowsq_ref[...] = jnp.sum(d * d, axis=-1, keepdims=True)  # (TR, 1)


def _row_tile(num_rows, row_bytes, itemsize):
    """Largest row tile within the per-input VMEM budget, dtype-aware sublane alignment."""
    align = max(8, 32 // max(itemsize, 1))  # 8 rows (f32), 16 (bf16), 32 (int8/fp8)
    budget_rows = (_TILE_BYTES_PER_INPUT // max(row_bytes, 1)) // align * align
    budget_rows = max(align, budget_rows)
    if num_rows <= budget_rows:
        return num_rows  # single full-extent block: always a legal BlockSpec
    return budget_rows


def joints_mse_loss(output, target, target_weight, use_target_weight=True):
    """output/target: (B, J, H, W); target_weight: (B, J) or (B, J, 1). Returns scalar f32."""
    B, J, H, W = output.shape
    HW = H * W
    R = B * J

    # Contiguous (free) reshapes of the NCHW heatmaps -- no transposes, no extra HBM traffic.
    pred = output.reshape(R, HW)
    gt = target.reshape(R, HW)

    itemsize = jnp.dtype(output.dtype).itemsize
    tr = _row_tile(R, HW * itemsize, itemsize)
    num_tiles = pl.cdiv(R, tr)
    r_pad = num_tiles * tr  # output rows; tail rows (>= R) hold unspecified values, sliced off below

    data_spec = pl.BlockSpec((tr, HW), lambda i: (i, 0))

    row_sq = pl.pallas_call(
        _joints_mse_kernel,
        out_shape=jax.ShapeDtypeStruct((r_pad, 1), jnp.float32),
        grid_spec=pltpu.PrefetchScalarGridSpec(
            num_scalar_prefetch=0,
            grid=(num_tiles,),
            in_specs=[data_spec, data_spec],
            out_specs=pl.BlockSpec((tr, 1), lambda i: (i, 0)),
        ),
        compiler_params=pltpu.CompilerParams(
            # Independent per-tile partial sums: lets Mosaic shard tiles across both
            # TensorCores on v7x; measured-neutral on single-TC v5e/v6e.
            dimension_semantics=("parallel",),
            vmem_limit_bytes=32 * 1024 * 1024,  # covers v5e's 16 MiB default scoped VMEM
        ),
        cost_estimate=pl.CostEstimate(
            flops=int(3 * R * HW),
            transcendentals=0,
            bytes_accessed=int(2 * R * HW * itemsize + r_pad * 4),
        ),
    )(pred, gt)

    row_sq = row_sq[:R, 0]  # drop unspecified tail rows from the overhanging last tile
    scale = 0.5 / float(B * HW * J)
    if use_target_weight:
        # (w*p - w*g)^2 == w^2 * (p - g)^2 : apply the tiny per-row weighting here.
        w = target_weight.reshape(R).astype(jnp.float32)
        return jnp.sum(row_sq * (w * w)) * scale
    return jnp.sum(row_sq) * scale


def _reference_loss(output, target, target_weight, use_target_weight=True):
    B, J, H, W = output.shape
    pred = output.reshape(B, J, H * W).astype(jnp.float32)
    gt = target.reshape(B, J, H * W).astype(jnp.float32)
    w = target_weight.reshape(B, J, 1).astype(jnp.float32)
    if use_target_weight:
        pred = pred * w
        gt = gt * w
    per_joint = 0.5 * jnp.mean((pred - gt) ** 2, axis=(0, 2))  # mean over B*HW
    return jnp.sum(per_joint) / J


if __name__ == "__main__":
    key = jax.random.PRNGKey(0)
    k1, k2, k3 = jax.random.split(key, 3)

    B, J, H, W = 2, 4, 16, 16
    output = jax.random.normal(k1, (B, J, H, W), dtype=jnp.float32)
    target = jax.random.normal(k2, (B, J, H, W), dtype=jnp.float32)
    target_weight = jax.random.uniform(k3, (B, J, 1), dtype=jnp.float32)

    loss = jax.block_until_ready(
        joints_mse_loss(output, target, target_weight, use_target_weight=True)
    )
    ref = _reference_loss(output, target, target_weight, use_target_weight=True)
    assert jnp.allclose(loss, ref, rtol=1e-5, atol=1e-6), (loss, ref)

    # use_target_weight=False path (weighting skipped entirely in the wrapper).
    loss_nw = jax.block_until_ready(
        joints_mse_loss(output, target, target_weight, use_target_weight=False)
    )
    ref_nw = _reference_loss(output, target, target_weight, use_target_weight=False)
    assert jnp.allclose(loss_nw, ref_nw, rtol=1e-5, atol=1e-6), (loss_nw, ref_nw)

    print("KERNEL_OK")
</pallas_src>

<mosaic_0001>
module attributes {stable_mosaic.version = 11 : i64} {
  func.func @_joints_mse_kernel(%arg0: i32, %arg1: memref<8x256xf32, #tpu.memory_space<vmem>>, %arg2: memref<8x256xf32, #tpu.memory_space<vmem>>, %arg3: memref<8x1xf32, #tpu.memory_space<vmem>>) attributes {dimension_semantics = [#tpu.dimension_semantics<parallel>], iteration_bounds = array<i64: 1>, scalar_prefetch = 0 : i64, scratch_operands = 0 : i64, tpu.core_type = #tpu.core_type<tc>, window_params = [{transform_indices = @transform_0, window_bounds = array<i64: 8, 256>}, {transform_indices = @transform_1, window_bounds = array<i64: 8, 256>}, {transform_indices = @transform_2, window_bounds = array<i64: 8, 1>}]} {
    %c0 = arith.constant 0 : index
    %c0_0 = arith.constant 0 : index
    %0 = vector.load %arg1[%c0, %c0_0] : memref<8x256xf32, #tpu.memory_space<vmem>>, vector<8x256xf32>
    %c0_1 = arith.constant 0 : index
    %c0_2 = arith.constant 0 : index
    %1 = vector.load %arg2[%c0_1, %c0_2] : memref<8x256xf32, #tpu.memory_space<vmem>>, vector<8x256xf32>
    %2 = arith.subf %0, %1 : vector<8x256xf32>
    %3 = arith.mulf %2, %2 : vector<8x256xf32>
    %cst = arith.constant dense<0.000000e+00> : vector<8xf32>
    %4 = vector.multi_reduction <add>, %3, %cst [1] : vector<8x256xf32> to vector<8xf32>
    %5 = vector.shape_cast %4 : vector<8xf32> to vector<8x1xf32>
    %c0_3 = arith.constant 0 : index
    %c0_4 = arith.constant 0 : index
    %6 = vector.load %arg3[%c0_3, %c0_4] : memref<8x1xf32, #tpu.memory_space<vmem>>, vector<8x1xf32>
    tpu.vector_store %arg3[%c0_3, %c0_4], %5 {strides = array<i32>} : memref<8x1xf32, #tpu.memory_space<vmem>>, vector<8x1xf32>,
    return
  }
  func.func @transform_0(%arg0: i32) -> (i32, i32) {
    %c0_i32 = arith.constant 0 : i32
    %c0_i32_0 = arith.constant 0 : i32
    return %arg0, %c0_i32 : i32, i32
  }
  func.func @transform_1(%arg0: i32) -> (i32, i32) {
    %c0_i32 = arith.constant 0 : i32
    %c0_i32_0 = arith.constant 0 : i32
    return %arg0, %c0_i32 : i32, i32
  }
  func.func @transform_2(%arg0: i32) -> (i32, i32) {
    %c0_i32 = arith.constant 0 : i32
    %c0_i32_0 = arith.constant 0 : i32
    return %arg0, %c0_i32 : i32, i32
  }
}

</mosaic_0001>

<bundles_post_ra>
// kernel: tpu_custom_call.1
= control target key start
LH: loop header
LB: loop body
LE: loop exit
PB: predicated region body
PF: predicated region fallthrough
CT: control target
= control target key end

     0   :  { %7 = vsyncpa [#allocation3], 0  ;;  %s148_s0 = inlined_call_operand.hbm [shape: f32[8,256], index: 0, kind: input, shape index: {}]   ;;  %s149_s1 = inlined_call_operand.hbm [shape: f32[8,256], index: 1, kind: input, shape index: {}]   ;;  %s150_s2 = inlined_call_operand.vmem [shape: f32[8,1], index: 2, kind: output, shape index: {}]  }
   0x1   :  { %8 = vsyncpa [#allocation5], 0  ;;  %s104_s9 = smov [#allocation2]   ;;  %s105_s11 = smov [#allocation4]  }
   0x2   :  { %s15_s10 = sshll.u32 %s104_s9, 4  ;;  %s25_s12 = sshll.u32 %s105_s11, 4  ;;  %s16_s10 = int_to_ptr.vmem [resolvable:$true] %s15_s10  ;;  %s26_s12 = int_to_ptr.vmem [resolvable:$true] %s25_s12 }
   0x3   :  { %s56_s15 = scalar_lea.hbm %s148_s0, 256 }
   0x4   :  { %p57_p0 = scmp.ne.s32.totalorder %s148_s0, %s56_s15  ;;  %p60_p1 = scmp.lt.u32.totalorder %s56_s15, %s148_s0 }
   0x6   :  { %p62_p2 = pnand %p60_p1, %p57_p0 }
   0x8   :  { %65 = shalt.err (!%p62_p2)
}
   0x9   :  { %s66_s20 = scalar_lea.vmem %s16_s10, 256  ;;  %p71_p4 = scmp.lt.s32.totalorder %s16_s10, %s16_s10 }
   0xa   :  { %p67_p3 = scmp.ne.s32.totalorder %s16_s10, %s66_s20  ;;  %p72_p5 = scmp.lt.s32.totalorder %s66_s20, %s66_s20 }
   0xc   :  { %p73_p6 = por %p72_p5, %p71_p4 }
   0xe   :  { %p74_p7 = pnand %p73_p6, %p67_p3 }
  0x10   :  { %77 = shalt.err (!%p74_p7)
}
  0x11   :  { %18 = dma.hbm_to_vmem [thread:$0]  %s148_s0, 256, %s16_s10, [#allocation3]  }
  0x12   :  { %s78_s25 = scalar_lea.hbm %s149_s1, 256 }
  0x13   :  { %p79_p8 = scmp.ne.s32.totalorder %s149_s1, %s78_s25  ;;  %p82_p9 = scmp.lt.u32.totalorder %s78_s25, %s149_s1 }
  0x15   :  { %p84_p10 = pnand %p82_p9, %p79_p8 }
  0x17   :  { %87 = shalt.err (!%p84_p10)
}
  0x18   :  { %s88_s30 = scalar_lea.vmem %s26_s12, 256  ;;  %p93_p12 = scmp.lt.s32.totalorder %s26_s12, %s26_s12 }
  0x19   :  { %p89_p11 = scmp.ne.s32.totalorder %s26_s12, %s88_s30  ;;  %p94_p13 = scmp.lt.s32.totalorder %s88_s30, %s88_s30 }
  0x1b   :  { %p95_p0 = por %p94_p13, %p93_p12 }
  0x1d   :  { %p96_p1 = pnand %p95_p0, %p89_p11 }
  0x1f   :  { %99 = shalt.err (!%p96_p1)
}
  0x20   :  { %28 = dma.hbm_to_vmem [thread:$0]  %s149_s1, 256, %s26_s12, [#allocation5]  }
  0x21   :  { %100 = dma.done.wait [#allocation3], 256  }
  0x22   :  { %101 = vsyncadd [#allocation3], 4294967040 }
  0x23   :  { %102 = dma.done.wait [#allocation5], 256  }
  0x24   :  { %103 = vsyncadd [#allocation5], 4294967040  ;;  %v35_v0 = vld [vmem:[#allocation2] sm:$0xff]  ;;  %v36_v1 = vld [vmem:[#allocation2 + $0x8] sm:$0xff]  ;;  %vm46_vm0 = vcmask 7168  }
  0x25   :  { %v37_v2 = vld [vmem:[#allocation4] sm:$0xff]  ;;  %v38_v3 = vld [vmem:[#allocation4 + $0x8] sm:$0xff] }
  0x26   :  { %v39_v4 = vsub.f32 %v35_v0, %v37_v2  ;;  %v40_v5 = vsub.f32 %v36_v1, %v38_v3 }
  0x28   :  { %v41_v6 = vmul.f32 %v39_v4, %v39_v4  ;;  %v42_v7 = vmul.f32 %v40_v5, %v40_v5 }
  0x2a   :  { %v43_v8 = vadd.f32 %v42_v7, %v41_v6 }
  0x2c   :  { %44 = vadd.xlane.f32.xlu0 %v43_v8 }
  0xb9   :  { %v45_v9 = vpop.xlane.xlu0 %44 }
  0xba   :  { %47 = vst.msk [vmem:[%s150_s2] sm:$0xff] %vm46_vm0, %v45_v9 }
  0xbb   :  { %52 = vsyncpa [#allocation3], 1 }
  0xbc   :  { %53 = vsyncpa [#allocation5], 1 }

</bundles_post_ra>
